<compile_context>
chip_gen: v5e
topology: v5e:2x2
jax: 0.10.0
libtpu: 0.0.40
codegen_flags: <defaults>
</compile_context>

<pallas_src>
import functools

import jax
import jax.numpy as jnp
from jax import lax
from jax.experimental import pallas as pl
from jax.experimental.pallas import tpu as pltpu

# ----------------------------- config (small, CLIP-text-like) -----------------
VOCAB = 100      # real model: 49408
MAX_LEN = 8      # real model: 77 (pad to 80 for sublane alignment at real size)
D = 32           # hidden size (real: 768)
H = 4            # attention heads (real: 12)
DH = D // H      # head dim
FF = 4 * D       # MLP intermediate (real: 3072)
LAYERS = 2       # real: 12
B = 2            # batch
EPS = 1e-5       # CLIP LayerNorm eps
NEG = -1e30      # additive mask value (scores kept in f32)


# ----------------------------- in-kernel helpers -------------------------------
def _layernorm_f32(x, g, b):
    mean = jnp.mean(x, axis=-1, keepdims=True)
    var = jnp.mean((x - mean) ** 2, axis=-1, keepdims=True)
    return (x - mean) * lax.rsqrt(var + EPS) * g + b


# ----------------------------- fused encoder-layer kernel ----------------------
def encoder_layer_kernel(x_ref, mask_ref,
                         ln1_g_ref, ln1_b_ref,
                         wqkv_ref, bqkv_ref,
                         wo_ref, bo_ref,
                         ln2_g_ref, ln2_b_ref,
                         w1_ref, b1_ref,
                         w2_ref, b2_ref,
                         o_ref, *, heads, head_dim, scale):
    # One batch element per grid step; everything below stays in VMEM/vregs.
    x = x_ref[0].astype(jnp.float32)                      # (S, D) residual stream
    d = x.shape[-1]
    mask = mask_ref[...]                                  # (S, S) additive causal bias

    # --- self-attention block (pre-LN), QKV fused into one MXU pass ---
    h = _layernorm_f32(x, ln1_g_ref[...], ln1_b_ref[...])
    qkv = jnp.dot(h.astype(jnp.bfloat16), wqkv_ref[...],
                  preferred_element_type=jnp.float32) + bqkv_ref[...]   # (S, 3D)
    q = qkv[:, 0:d]
    k = qkv[:, d:2 * d]
    v = qkv[:, 2 * d:3 * d]

    head_outs = []
    for hd in range(heads):                               # static loop, all in VMEM
        lo = hd * head_dim
        qh = q[:, lo:lo + head_dim].astype(jnp.bfloat16)  # (S, DH)
        kh = k[:, lo:lo + head_dim].astype(jnp.bfloat16)
        vh = v[:, lo:lo + head_dim].astype(jnp.bfloat16)
        # scores = q @ k^T  (rhs contraction on last dim -> no explicit transpose)
        s = lax.dot_general(qh, kh, (((1,), (1,)), ((), ())),
                            preferred_element_type=jnp.float32)         # (S, S)
        s = s * scale + mask                              # causal mask (precomputed)
        m = jnp.max(s, axis=-1, keepdims=True)
        p = jnp.exp(s - m)
        inv = pl.reciprocal(jnp.sum(p, axis=-1, keepdims=True), approx=True)
        p = p * inv
        head_outs.append(jnp.dot(p.astype(jnp.bfloat16), vh,
                                 preferred_element_type=jnp.float32))   # (S, DH)
    a = jnp.concatenate(head_outs, axis=-1)               # (S, D), lane-dense

    a = jnp.dot(a.astype(jnp.bfloat16), wo_ref[...],
                preferred_element_type=jnp.float32) + bo_ref[...]
    x = x + a                                             # residual fused in-kernel

    # --- MLP block (pre-LN, quick_gelu), residual fused in-kernel ---
    h = _layernorm_f32(x, ln2_g_ref[...], ln2_b_ref[...])
    y = jnp.dot(h.astype(jnp.bfloat16), w1_ref[...],
                preferred_element_type=jnp.float32) + b1_ref[...]
    y = y * jax.nn.sigmoid(1.702 * y)                     # quick_gelu (sigmoid on EUP)
    y = jnp.dot(y.astype(jnp.bfloat16), w2_ref[...],
                preferred_element_type=jnp.float32) + b2_ref[...]
    o_ref[0] = (x + y).astype(o_ref.dtype)


def final_ln_kernel(x_ref, g_ref, b_ref, o_ref):
    x = x_ref[0].astype(jnp.float32)
    o_ref[0] = _layernorm_f32(x, g_ref[...], b_ref[...]).astype(o_ref.dtype)


# ----------------------------- wrappers ----------------------------------------
def encoder_layer(x, mask, lyr):
    b, s, d = x.shape
    kern = functools.partial(encoder_layer_kernel,
                             heads=H, head_dim=DH, scale=DH ** -0.5)
    row_spec = pl.BlockSpec((1, s, d), lambda i: (i, 0, 0))
    args = (x, mask,
            lyr["ln1_g"], lyr["ln1_b"], lyr["w_qkv"], lyr["b_qkv"],
            lyr["wo"], lyr["bo"], lyr["ln2_g"], lyr["ln2_b"],
            lyr["w1"], lyr["b1"], lyr["w2"], lyr["b2"])
    # Weights / mask use a constant block index -> fetched once, stay VMEM-resident.
    in_specs = [row_spec] + [pl.BlockSpec(a.shape, lambda i: (0, 0)) for a in args[1:]]
    # TODO(synk): at real CLIP sizes (D=768, FF=3072) tile the FF matmuls over Dout
    # inside this kernel (emit_pipeline) and set vmem_limit_bytes for v7x's 64 MiB VMEM.
    return pl.pallas_call(
        kern,
        grid=(b,),
        in_specs=in_specs,
        out_specs=row_spec,
        out_shape=jax.ShapeDtypeStruct((b, s, d), x.dtype),
        input_output_aliases={0: 0},           # update the residual stream in place
        compiler_params=pltpu.CompilerParams(dimension_semantics=("parallel",)),
    )(*args)


def final_layernorm(x, g, b):
    bsz, s, d = x.shape
    return pl.pallas_call(
        final_ln_kernel,
        grid=(bsz,),
        in_specs=[pl.BlockSpec((1, s, d), lambda i: (i, 0, 0)),
                  pl.BlockSpec((1, d), lambda i: (0, 0)),
                  pl.BlockSpec((1, d), lambda i: (0, 0))],
        out_specs=pl.BlockSpec((1, s, d), lambda i: (i, 0, 0)),
        out_shape=jax.ShapeDtypeStruct((bsz, s, d), x.dtype),
        compiler_params=pltpu.CompilerParams(dimension_semantics=("parallel",)),
    )(x, g, b)


# ----------------------------- parameter init ----------------------------------
def init_params(key):
    keys = iter(jax.random.split(key, 2 + 6 * LAYERS))

    def w(shape, scale=0.02):
        return (scale * jax.random.normal(next(keys), shape)).astype(jnp.float32)

    params = {
        "tok_emb": w((VOCAB, D)),
        "pos_emb": w((MAX_LEN, D)),
        "lnf_g": jnp.ones((1, D), jnp.float32),
        "lnf_b": jnp.zeros((1, D), jnp.float32),
        "layers": [],
    }
    for _ in range(LAYERS):
        wq, wk, wv = w((D, D)), w((D, D)), w((D, D))
        params["layers"].append({
            "ln1_g": jnp.ones((1, D), jnp.float32),
            "ln1_b": jnp.zeros((1, D), jnp.float32),
            # fused QKV weight, stored bf16 for the MXU (accumulation stays f32)
            "w_qkv": jnp.concatenate([wq, wk, wv], axis=1).astype(jnp.bfloat16),
            "b_qkv": jnp.zeros((1, 3 * D), jnp.float32),
            "wo": w((D, D)).astype(jnp.bfloat16),
            "bo": jnp.zeros((1, D), jnp.float32),
            "ln2_g": jnp.ones((1, D), jnp.float32),
            "ln2_b": jnp.zeros((1, D), jnp.float32),
            "w1": w((D, FF)).astype(jnp.bfloat16),
            "b1": jnp.zeros((1, FF), jnp.float32),
            "w2": w((FF, D)).astype(jnp.bfloat16),
            "b2": jnp.zeros((1, D), jnp.float32),
        })
    return params


# ----------------------------- forward (CLIPTextModel.last_hidden_state) -------
def _causal_mask_bias(s):
    row = jnp.arange(s)[:, None]
    col = jnp.arange(s)[None, :]
    return jnp.where(col <= row, 0.0, NEG).astype(jnp.float32)


@jax.jit
def frozen_clip_embedder_forward(params, tokens):
    # TODO(synk): CLIPTokenizer (string -> token ids, padding/truncation) is pure
    # Python string processing with no Pallas equivalent; tokens are taken as input.
    b, s = tokens.shape
    # Embedding gather + positional add done as XLA glue (data-dependent gather).
    x = (params["tok_emb"][tokens] + params["pos_emb"][:s][None, :, :]).astype(jnp.float32)
    mask = _causal_mask_bias(s)
    for lyr in params["layers"]:
        x = encoder_layer(x, mask, lyr)          # one fused pallas_call per layer
    return final_layernorm(x, params["lnf_g"], params["lnf_b"])   # last_hidden_state


# ----------------------------- main ---------------------------------------------
if __name__ == "__main__":
    key = jax.random.PRNGKey(0)
    pkey, tkey = jax.random.split(key)
    params = init_params(pkey)
    tokens = jax.random.randint(tkey, (B, MAX_LEN), 0, VOCAB, dtype=jnp.int32)

    z = frozen_clip_embedder_forward(params, tokens)
    z = jax.block_until_ready(z)
    assert z.shape == (B, MAX_LEN, D) and z.dtype == jnp.float32
    print("KERNEL_OK")
</pallas_src>

<mosaic_0001>
module attributes {stable_mosaic.version = 11 : i64} {
  func.func @final_ln_kernel(%arg0: i32, %arg1: memref<1x8x32xf32, #tpu.memory_space<vmem>>, %arg2: memref<1x32xf32, #tpu.memory_space<vmem>>, %arg3: memref<1x32xf32, #tpu.memory_space<vmem>>, %arg4: memref<1x8x32xf32, #tpu.memory_space<vmem>>) attributes {dimension_semantics = [#tpu.dimension_semantics<parallel>], iteration_bounds = array<i64: 2>, scalar_prefetch = 0 : i64, scratch_operands = 0 : i64, tpu.core_type = #tpu.core_type<tc>, window_params = [{transform_indices = @transform_0, window_bounds = array<i64: 1, 8, 32>}, {pipeline_mode = #tpu.pipeline_mode<synchronous>, transform_indices = @transform_1, window_bounds = array<i64: 1, 32>}, {pipeline_mode = #tpu.pipeline_mode<synchronous>, transform_indices = @transform_2, window_bounds = array<i64: 1, 32>}, {transform_indices = @transform_3, window_bounds = array<i64: 1, 8, 32>}]} {
    %c0 = arith.constant 0 : index
    %c0_0 = arith.constant 0 : index
    %c0_1 = arith.constant 0 : index
    %0 = vector.load %arg1[%c0, %c0_0, %c0_1] : memref<1x8x32xf32, #tpu.memory_space<vmem>>, vector<1x8x32xf32>
    %1 = vector.shape_cast %0 : vector<1x8x32xf32> to vector<8x32xf32>
    %c0_2 = arith.constant 0 : index
    %c0_3 = arith.constant 0 : index
    %2 = vector.load %arg2[%c0_2, %c0_3] : memref<1x32xf32, #tpu.memory_space<vmem>>, vector<1x32xf32>
    %c0_4 = arith.constant 0 : index
    %c0_5 = arith.constant 0 : index
    %3 = vector.load %arg3[%c0_4, %c0_5] : memref<1x32xf32, #tpu.memory_space<vmem>>, vector<1x32xf32>
    %cst = arith.constant dense<0.000000e+00> : vector<8xf32>
    %4 = vector.multi_reduction <add>, %1, %cst [1] : vector<8x32xf32> to vector<8xf32>
    %5 = vector.shape_cast %4 : vector<8xf32> to vector<8x1xf32>
    %cst_6 = arith.constant 3.200000e+01 : f32
    %6 = vector.broadcast %cst_6 : f32 to vector<8x1xf32>
    %7 = arith.divf %5, %6 : vector<8x1xf32>
    %8 = vector.broadcast %7 : vector<8x1xf32> to vector<8x32xf32>
    %9 = arith.subf %1, %8 : vector<8x32xf32>
    %10 = arith.mulf %9, %9 : vector<8x32xf32>
    %cst_7 = arith.constant dense<0.000000e+00> : vector<8xf32>
    %11 = vector.multi_reduction <add>, %10, %cst_7 [1] : vector<8x32xf32> to vector<8xf32>
    %12 = vector.shape_cast %11 : vector<8xf32> to vector<8x1xf32>
    %cst_8 = arith.constant 3.200000e+01 : f32
    %13 = vector.broadcast %cst_8 : f32 to vector<8x1xf32>
    %14 = arith.divf %12, %13 : vector<8x1xf32>
    %15 = vector.broadcast %7 : vector<8x1xf32> to vector<8x32xf32>
    %16 = arith.subf %1, %15 : vector<8x32xf32>
    %cst_9 = arith.constant 9.99999974E-6 : f32
    %17 = vector.broadcast %cst_9 : f32 to vector<8x1xf32>
    %18 = arith.addf %14, %17 : vector<8x1xf32>
    %19 = math.rsqrt %18 : vector<8x1xf32>
    %20 = vector.broadcast %19 : vector<8x1xf32> to vector<8x32xf32>
    %21 = arith.mulf %16, %20 : vector<8x32xf32>
    %22 = vector.broadcast %2 : vector<1x32xf32> to vector<8x32xf32>
    %23 = arith.mulf %21, %22 : vector<8x32xf32>
    %24 = vector.broadcast %3 : vector<1x32xf32> to vector<8x32xf32>
    %25 = arith.addf %23, %24 : vector<8x32xf32>
    %c0_10 = arith.constant 0 : index
    %c0_11 = arith.constant 0 : index
    %c0_12 = arith.constant 0 : index
    %26 = vector.load %arg4[%c0_10, %c0_11, %c0_12] : memref<1x8x32xf32, #tpu.memory_space<vmem>>, vector<1x8x32xf32>
    %27 = vector.shape_cast %26 : vector<1x8x32xf32> to vector<8x32xf32>
    %28 = vector.shape_cast %25 : vector<8x32xf32> to vector<1x8x32xf32>
    tpu.vector_store %arg4[%c0_10, %c0_11, %c0_12], %28 {strides = array<i32>} : memref<1x8x32xf32, #tpu.memory_space<vmem>>, vector<1x8x32xf32>,
    return
  }
  func.func @transform_0(%arg0: i32) -> (i32, i32, i32) {
    %c0_i32 = arith.constant 0 : i32
    %c0_i32_0 = arith.constant 0 : i32
    %c0_i32_1 = arith.constant 0 : i32
    return %arg0, %c0_i32, %c0_i32_0 : i32, i32, i32
  }
  func.func @transform_1(%arg0: i32) -> (i32, i32) {
    %c0_i32 = arith.constant 0 : i32
    %c0_i32_0 = arith.constant 0 : i32
    %c0_i32_1 = arith.constant 0 : i32
    return %c0_i32, %c0_i32_0 : i32, i32
  }
  func.func @transform_2(%arg0: i32) -> (i32, i32) {
    %c0_i32 = arith.constant 0 : i32
    %c0_i32_0 = arith.constant 0 : i32
    %c0_i32_1 = arith.constant 0 : i32
    return %c0_i32, %c0_i32_0 : i32, i32
  }
  func.func @transform_3(%arg0: i32) -> (i32, i32, i32) {
    %c0_i32 = arith.constant 0 : i32
    %c0_i32_0 = arith.constant 0 : i32
    %c0_i32_1 = arith.constant 0 : i32
    return %arg0, %c0_i32, %c0_i32_0 : i32, i32, i32
  }
}

module attributes {stable_mosaic.version = 11 : i64} {
  func.func @encoder_layer_kernel(%arg0: i32, %arg1: memref<1x8x32xf32, #tpu.memory_space<vmem>>, %arg2: memref<8x8xf32, #tpu.memory_space<vmem>>, %arg3: memref<1x32xf32, #tpu.memory_space<vmem>>, %arg4: memref<1x32xf32, #tpu.memory_space<vmem>>, %arg5: memref<32x96xbf16, #tpu.memory_space<vmem>>, %arg6: memref<1x96xf32, #tpu.memory_space<vmem>>, %arg7: memref<32x32xbf16, #tpu.memory_space<vmem>>, %arg8: memref<1x32xf32, #tpu.memory_space<vmem>>, %arg9: memref<1x32xf32, #tpu.memory_space<vmem>>, %arg10: memref<1x32xf32, #tpu.memory_space<vmem>>, %arg11: memref<32x128xbf16, #tpu.memory_space<vmem>>, %arg12: memref<1x128xf32, #tpu.memory_space<vmem>>, %arg13: memref<128x32xbf16, #tpu.memory_space<vmem>>, %arg14: memref<1x32xf32, #tpu.memory_space<vmem>>, %arg15: memref<1x8x32xf32, #tpu.memory_space<vmem>>) attributes {dimension_semantics = [#tpu.dimension_semantics<parallel>], iteration_bounds = array<i64: 2>, scalar_prefetch = 0 : i64, scratch_operands = 0 : i64, tpu.core_type = #tpu.core_type<tc>, window_params = [{transform_indices = @transform_0, window_bounds = array<i64: 1, 8, 32>}, {pipeline_mode = #tpu.pipeline_mode<synchronous>, transform_indices = @transform_1, window_bounds = array<i64: 8, 8>}, {pipeline_mode = #tpu.pipeline_mode<synchronous>, transform_indices = @transform_2, window_bounds = array<i64: 1, 32>}, {pipeline_mode = #tpu.pipeline_mode<synchronous>, transform_indices = @transform_3, window_bounds = array<i64: 1, 32>}, {pipeline_mode = #tpu.pipeline_mode<synchronous>, transform_indices = @transform_4, window_bounds = array<i64: 32, 96>}, {pipeline_mode = #tpu.pipeline_mode<synchronous>, transform_indices = @transform_5, window_bounds = array<i64: 1, 96>}, {pipeline_mode = #tpu.pipeline_mode<synchronous>, transform_indices = @transform_6, window_bounds = array<i64: 32, 32>}, {pipeline_mode = #tpu.pipeline_mode<synchronous>, transform_indices = @transform_7, window_bounds = array<i64: 1, 32>}, {pipeline_mode = #tpu.pipeline_mode<synchronous>, transform_indices = @transform_8, window_bounds = array<i64: 1, 32>}, {pipeline_mode = #tpu.pipeline_mode<synchronous>, transform_indices = @transform_9, window_bounds = array<i64: 1, 32>}, {pipeline_mode = #tpu.pipeline_mode<synchronous>, transform_indices = @transform_10, window_bounds = array<i64: 32, 128>}, {pipeline_mode = #tpu.pipeline_mode<synchronous>, transform_indices = @transform_11, window_bounds = array<i64: 1, 128>}, {pipeline_mode = #tpu.pipeline_mode<synchronous>, transform_indices = @transform_12, window_bounds = array<i64: 128, 32>}, {pipeline_mode = #tpu.pipeline_mode<synchronous>, transform_indices = @transform_13, window_bounds = array<i64: 1, 32>}, {transform_indices = @transform_14, window_bounds = array<i64: 1, 8, 32>}]} {
    %c0 = arith.constant 0 : index
    %c0_0 = arith.constant 0 : index
    %c0_1 = arith.constant 0 : index
    %0 = vector.load %arg1[%c0, %c0_0, %c0_1] : memref<1x8x32xf32, #tpu.memory_space<vmem>>, vector<1x8x32xf32>
    %1 = vector.shape_cast %0 : vector<1x8x32xf32> to vector<8x32xf32>
    %c0_2 = arith.constant 0 : index
    %c0_3 = arith.constant 0 : index
    %2 = vector.load %arg2[%c0_2, %c0_3] : memref<8x8xf32, #tpu.memory_space<vmem>>, vector<8x8xf32>
    %c0_4 = arith.constant 0 : index
    %c0_5 = arith.constant 0 : index
    %3 = vector.load %arg3[%c0_4, %c0_5] : memref<1x32xf32, #tpu.memory_space<vmem>>, vector<1x32xf32>
    %c0_6 = arith.constant 0 : index
    %c0_7 = arith.constant 0 : index
    %4 = vector.load %arg4[%c0_6, %c0_7] : memref<1x32xf32, #tpu.memory_space<vmem>>, vector<1x32xf32>
    %cst = arith.constant dense<0.000000e+00> : vector<8xf32>
    %5 = vector.multi_reduction <add>, %1, %cst [1] : vector<8x32xf32> to vector<8xf32>
    %6 = vector.shape_cast %5 : vector<8xf32> to vector<8x1xf32>
    %cst_8 = arith.constant 3.200000e+01 : f32
    %7 = vector.broadcast %cst_8 : f32 to vector<8x1xf32>
    %8 = arith.divf %6, %7 : vector<8x1xf32>
    %9 = vector.broadcast %8 : vector<8x1xf32> to vector<8x32xf32>
    %10 = arith.subf %1, %9 : vector<8x32xf32>
    %11 = arith.mulf %10, %10 : vector<8x32xf32>
    %cst_9 = arith.constant dense<0.000000e+00> : vector<8xf32>
    %12 = vector.multi_reduction <add>, %11, %cst_9 [1] : vector<8x32xf32> to vector<8xf32>
    %13 = vector.shape_cast %12 : vector<8xf32> to vector<8x1xf32>
    %cst_10 = arith.constant 3.200000e+01 : f32
    %14 = vector.broadcast %cst_10 : f32 to vector<8x1xf32>
    %15 = arith.divf %13, %14 : vector<8x1xf32>
    %16 = vector.broadcast %8 : vector<8x1xf32> to vector<8x32xf32>
    %17 = arith.subf %1, %16 : vector<8x32xf32>
    %cst_11 = arith.constant 9.99999974E-6 : f32
    %18 = vector.broadcast %cst_11 : f32 to vector<8x1xf32>
    %19 = arith.addf %15, %18 : vector<8x1xf32>
    %20 = math.rsqrt %19 : vector<8x1xf32>
    %21 = vector.broadcast %20 : vector<8x1xf32> to vector<8x32xf32>
    %22 = arith.mulf %17, %21 : vector<8x32xf32>
    %23 = vector.broadcast %3 : vector<1x32xf32> to vector<8x32xf32>
    %24 = arith.mulf %22, %23 : vector<8x32xf32>
    %25 = vector.broadcast %4 : vector<1x32xf32> to vector<8x32xf32>
    %26 = arith.addf %24, %25 : vector<8x32xf32>
    %27 = arith.truncf %26 : vector<8x32xf32> to vector<8x32xbf16>
    %c0_12 = arith.constant 0 : index
    %c0_13 = arith.constant 0 : index
    %28 = vector.load %arg5[%c0_12, %c0_13] : memref<32x96xbf16, #tpu.memory_space<vmem>>, vector<32x96xbf16>
    %cst_14 = arith.constant dense<0.000000e+00> : vector<8x96xf32>
    %29 = tpu.matmul %27, %28, %cst_14 {dimension_numbers = #tpu.dot_dimension_numbers<[1], [0], [0], [1], [0, 0, 1, 1], [], []>} : vector<8x32xbf16>, vector<32x96xbf16>, vector<8x96xf32> -> vector<8x96xf32>
    %c0_15 = arith.constant 0 : index
    %c0_16 = arith.constant 0 : index
    %30 = vector.load %arg6[%c0_15, %c0_16] : memref<1x96xf32, #tpu.memory_space<vmem>>, vector<1x96xf32>
    %31 = vector.broadcast %30 : vector<1x96xf32> to vector<8x96xf32>
    %32 = arith.addf %29, %31 : vector<8x96xf32>
    %33 = vector.extract_strided_slice %32 {offsets = [0, 0], sizes = [8, 32], strides = [1, 1]} : vector<8x96xf32> to vector<8x32xf32>
    %34 = vector.extract_strided_slice %32 {offsets = [0, 32], sizes = [8, 32], strides = [1, 1]} : vector<8x96xf32> to vector<8x32xf32>
    %35 = vector.extract_strided_slice %32 {offsets = [0, 64], sizes = [8, 32], strides = [1, 1]} : vector<8x96xf32> to vector<8x32xf32>
    %36 = vector.extract_strided_slice %33 {offsets = [0, 0], sizes = [8, 8], strides = [1, 1]} : vector<8x32xf32> to vector<8x8xf32>
    %37 = arith.truncf %36 : vector<8x8xf32> to vector<8x8xbf16>
    %38 = vector.extract_strided_slice %34 {offsets = [0, 0], sizes = [8, 8], strides = [1, 1]} : vector<8x32xf32> to vector<8x8xf32>
    %39 = arith.truncf %38 : vector<8x8xf32> to vector<8x8xbf16>
    %40 = vector.extract_strided_slice %35 {offsets = [0, 0], sizes = [8, 8], strides = [1, 1]} : vector<8x32xf32> to vector<8x8xf32>
    %41 = arith.truncf %40 : vector<8x8xf32> to vector<8x8xbf16>
    %cst_17 = arith.constant dense<0.000000e+00> : vector<8x8xf32>
    %42 = tpu.matmul %37, %39, %cst_17 {dimension_numbers = #tpu.dot_dimension_numbers<[1], [1], [0], [0], [0, 0, 1, 0], [], []>} : vector<8x8xbf16>, vector<8x8xbf16>, vector<8x8xf32> -> vector<8x8xf32>
    %cst_18 = arith.constant 0.353553385 : f32
    %43 = vector.broadcast %cst_18 : f32 to vector<8x8xf32>
    %44 = arith.mulf %42, %43 : vector<8x8xf32>
    %45 = arith.addf %44, %2 : vector<8x8xf32>
    %cst_19 = arith.constant dense<0xFF800000> : vector<8xf32>
    %46 = vector.multi_reduction <maximumf>, %45, %cst_19 [1] : vector<8x8xf32> to vector<8xf32>
    %47 = vector.shape_cast %46 : vector<8xf32> to vector<8x1xf32>
    %48 = vector.broadcast %47 : vector<8x1xf32> to vector<8x8xf32>
    %49 = arith.subf %45, %48 : vector<8x8xf32>
    %50 = math.exp %49 : vector<8x8xf32>
    %cst_20 = arith.constant dense<0.000000e+00> : vector<8xf32>
    %51 = vector.multi_reduction <add>, %50, %cst_20 [1] : vector<8x8xf32> to vector<8xf32>
    %52 = vector.shape_cast %51 : vector<8xf32> to vector<8x1xf32>
    %53 = tpu.reciprocal %52 {approx = true} : vector<8x1xf32> -> vector<8x1xf32>
    %54 = vector.broadcast %53 : vector<8x1xf32> to vector<8x8xf32>
    %55 = arith.mulf %50, %54 : vector<8x8xf32>
    %56 = arith.truncf %55 : vector<8x8xf32> to vector<8x8xbf16>
    %cst_21 = arith.constant dense<0.000000e+00> : vector<8x8xf32>
    %57 = tpu.matmul %56, %41, %cst_21 {dimension_numbers = #tpu.dot_dimension_numbers<[1], [0], [0], [1], [0, 0, 1, 1], [], []>} : vector<8x8xbf16>, vector<8x8xbf16>, vector<8x8xf32> -> vector<8x8xf32>
    %58 = vector.extract_strided_slice %33 {offsets = [0, 8], sizes = [8, 8], strides = [1, 1]} : vector<8x32xf32> to vector<8x8xf32>
    %59 = arith.truncf %58 : vector<8x8xf32> to vector<8x8xbf16>
    %60 = vector.extract_strided_slice %34 {offsets = [0, 8], sizes = [8, 8], strides = [1, 1]} : vector<8x32xf32> to vector<8x8xf32>
    %61 = arith.truncf %60 : vector<8x8xf32> to vector<8x8xbf16>
    %62 = vector.extract_strided_slice %35 {offsets = [0, 8], sizes = [8, 8], strides = [1, 1]} : vector<8x32xf32> to vector<8x8xf32>
    %63 = arith.truncf %62 : vector<8x8xf32> to vector<8x8xbf16>
    %cst_22 = arith.constant dense<0.000000e+00> : vector<8x8xf32>
    %64 = tpu.matmul %59, %61, %cst_22 {dimension_numbers = #tpu.dot_dimension_numbers<[1], [1], [0], [0], [0, 0, 1, 0], [], []>} : vector<8x8xbf16>, vector<8x8xbf16>, vector<8x8xf32> -> vector<8x8xf32>
    %cst_23 = arith.constant 0.353553385 : f32
    %65 = vector.broadcast %cst_23 : f32 to vector<8x8xf32>
    %66 = arith.mulf %64, %65 : vector<8x8xf32>
    %67 = arith.addf %66, %2 : vector<8x8xf32>
    %cst_24 = arith.constant dense<0xFF800000> : vector<8xf32>
    %68 = vector.multi_reduction <maximumf>, %67, %cst_24 [1] : vector<8x8xf32> to vector<8xf32>
    %69 = vector.shape_cast %68 : vector<8xf32> to vector<8x1xf32>
    %70 = vector.broadcast %69 : vector<8x1xf32> to vector<8x8xf32>
    %71 = arith.subf %67, %70 : vector<8x8xf32>
    %72 = math.exp %71 : vector<8x8xf32>
    %cst_25 = arith.constant dense<0.000000e+00> : vector<8xf32>
    %73 = vector.multi_reduction <add>, %72, %cst_25 [1] : vector<8x8xf32> to vector<8xf32>
    %74 = vector.shape_cast %73 : vector<8xf32> to vector<8x1xf32>
    %75 = tpu.reciprocal %74 {approx = true} : vector<8x1xf32> -> vector<8x1xf32>
    %76 = vector.broadcast %75 : vector<8x1xf32> to vector<8x8xf32>
    %77 = arith.mulf %72, %76 : vector<8x8xf32>
    %78 = arith.truncf %77 : vector<8x8xf32> to vector<8x8xbf16>
    %cst_26 = arith.constant dense<0.000000e+00> : vector<8x8xf32>
    %79 = tpu.matmul %78, %63, %cst_26 {dimension_numbers = #tpu.dot_dimension_numbers<[1], [0], [0], [1], [0, 0, 1, 1], [], []>} : vector<8x8xbf16>, vector<8x8xbf16>, vector<8x8xf32> -> vector<8x8xf32>
    %80 = vector.extract_strided_slice %33 {offsets = [0, 16], sizes = [8, 8], strides = [1, 1]} : vector<8x32xf32> to vector<8x8xf32>
    %81 = arith.truncf %80 : vector<8x8xf32> to vector<8x8xbf16>
    %82 = vector.extract_strided_slice %34 {offsets = [0, 16], sizes = [8, 8], strides = [1, 1]} : vector<8x32xf32> to vector<8x8xf32>
    %83 = arith.truncf %82 : vector<8x8xf32> to vector<8x8xbf16>
    %84 = vector.extract_strided_slice %35 {offsets = [0, 16], sizes = [8, 8], strides = [1, 1]} : vector<8x32xf32> to vector<8x8xf32>
    %85 = arith.truncf %84 : vector<8x8xf32> to vector<8x8xbf16>
    %cst_27 = arith.constant dense<0.000000e+00> : vector<8x8xf32>
    %86 = tpu.matmul %81, %83, %cst_27 {dimension_numbers = #tpu.dot_dimension_numbers<[1], [1], [0], [0], [0, 0, 1, 0], [], []>} : vector<8x8xbf16>, vector<8x8xbf16>, vector<8x8xf32> -> vector<8x8xf32>
    %cst_28 = arith.constant 0.353553385 : f32
    %87 = vector.broadcast %cst_28 : f32 to vector<8x8xf32>
    %88 = arith.mulf %86, %87 : vector<8x8xf32>
    %89 = arith.addf %88, %2 : vector<8x8xf32>
    %cst_29 = arith.constant dense<0xFF800000> : vector<8xf32>
    %90 = vector.multi_reduction <maximumf>, %89, %cst_29 [1] : vector<8x8xf32> to vector<8xf32>
    %91 = vector.shape_cast %90 : vector<8xf32> to vector<8x1xf32>
    %92 = vector.broadcast %91 : vector<8x1xf32> to vector<8x8xf32>
    %93 = arith.subf %89, %92 : vector<8x8xf32>
    %94 = math.exp %93 : vector<8x8xf32>
    %cst_30 = arith.constant dense<0.000000e+00> : vector<8xf32>
    %95 = vector.multi_reduction <add>, %94, %cst_30 [1] : vector<8x8xf32> to vector<8xf32>
    %96 = vector.shape_cast %95 : vector<8xf32> to vector<8x1xf32>
    %97 = tpu.reciprocal %96 {approx = true} : vector<8x1xf32> -> vector<8x1xf32>
    %98 = vector.broadcast %97 : vector<8x1xf32> to vector<8x8xf32>
    %99 = arith.mulf %94, %98 : vector<8x8xf32>
    %100 = arith.truncf %99 : vector<8x8xf32> to vector<8x8xbf16>
    %cst_31 = arith.constant dense<0.000000e+00> : vector<8x8xf32>
    %101 = tpu.matmul %100, %85, %cst_31 {dimension_numbers = #tpu.dot_dimension_numbers<[1], [0], [0], [1], [0, 0, 1, 1], [], []>} : vector<8x8xbf16>, vector<8x8xbf16>, vector<8x8xf32> -> vector<8x8xf32>
    %102 = vector.extract_strided_slice %33 {offsets = [0, 24], sizes = [8, 8], strides = [1, 1]} : vector<8x32xf32> to vector<8x8xf32>
    %103 = arith.truncf %102 : vector<8x8xf32> to vector<8x8xbf16>
    %104 = vector.extract_strided_slice %34 {offsets = [0, 24], sizes = [8, 8], strides = [1, 1]} : vector<8x32xf32> to vector<8x8xf32>
    %105 = arith.truncf %104 : vector<8x8xf32> to vector<8x8xbf16>
    %106 = vector.extract_strided_slice %35 {offsets = [0, 24], sizes = [8, 8], strides = [1, 1]} : vector<8x32xf32> to vector<8x8xf32>
    %107 = arith.truncf %106 : vector<8x8xf32> to vector<8x8xbf16>
    %cst_32 = arith.constant dense<0.000000e+00> : vector<8x8xf32>
    %108 = tpu.matmul %103, %105, %cst_32 {dimension_numbers = #tpu.dot_dimension_numbers<[1], [1], [0], [0], [0, 0, 1, 0], [], []>} : vector<8x8xbf16>, vector<8x8xbf16>, vector<8x8xf32> -> vector<8x8xf32>
    %cst_33 = arith.constant 0.353553385 : f32
    %109 = vector.broadcast %cst_33 : f32 to vector<8x8xf32>
    %110 = arith.mulf %108, %109 : vector<8x8xf32>
    %111 = arith.addf %110, %2 : vector<8x8xf32>
    %cst_34 = arith.constant dense<0xFF800000> : vector<8xf32>
    %112 = vector.multi_reduction <maximumf>, %111, %cst_34 [1] : vector<8x8xf32> to vector<8xf32>
    %113 = vector.shape_cast %112 : vector<8xf32> to vector<8x1xf32>
    %114 = vector.broadcast %113 : vector<8x1xf32> to vector<8x8xf32>
    %115 = arith.subf %111, %114 : vector<8x8xf32>
    %116 = math.exp %115 : vector<8x8xf32>
    %cst_35 = arith.constant dense<0.000000e+00> : vector<8xf32>
    %117 = vector.multi_reduction <add>, %116, %cst_35 [1] : vector<8x8xf32> to vector<8xf32>
    %118 = vector.shape_cast %117 : vector<8xf32> to vector<8x1xf32>
    %119 = tpu.reciprocal %118 {approx = true} : vector<8x1xf32> -> vector<8x1xf32>
    %120 = vector.broadcast %119 : vector<8x1xf32> to vector<8x8xf32>
    %121 = arith.mulf %116, %120 : vector<8x8xf32>
    %122 = arith.truncf %121 : vector<8x8xf32> to vector<8x8xbf16>
    %cst_36 = arith.constant dense<0.000000e+00> : vector<8x8xf32>
    %123 = tpu.matmul %122, %107, %cst_36 {dimension_numbers = #tpu.dot_dimension_numbers<[1], [0], [0], [1], [0, 0, 1, 1], [], []>} : vector<8x8xbf16>, vector<8x8xbf16>, vector<8x8xf32> -> vector<8x8xf32>
    %124 = tpu.concatenate %57, %79, %101, %123 in 1 : vector<8x8xf32>, vector<8x8xf32>, vector<8x8xf32>, vector<8x8xf32> -> vector<8x32xf32>
    %125 = arith.truncf %124 : vector<8x32xf32> to vector<8x32xbf16>
    %c0_37 = arith.constant 0 : index
    %c0_38 = arith.constant 0 : index
    %126 = vector.load %arg7[%c0_37, %c0_38] : memref<32x32xbf16, #tpu.memory_space<vmem>>, vector<32x32xbf16>
    %cst_39 = arith.constant dense<0.000000e+00> : vector<8x32xf32>
    %127 = tpu.matmul %125, %126, %cst_39 {dimension_numbers = #tpu.dot_dimension_numbers<[1], [0], [0], [1], [0, 0, 1, 1], [], []>} : vector<8x32xbf16>, vector<32x32xbf16>, vector<8x32xf32> -> vector<8x32xf32>
    %c0_40 = arith.constant 0 : index
    %c0_41 = arith.constant 0 : index
    %128 = vector.load %arg8[%c0_40, %c0_41] : memref<1x32xf32, #tpu.memory_space<vmem>>, vector<1x32xf32>
    %129 = vector.broadcast %128 : vector<1x32xf32> to vector<8x32xf32>
    %130 = arith.addf %127, %129 : vector<8x32xf32>
    %131 = arith.addf %1, %130 : vector<8x32xf32>
    %c0_42 = arith.constant 0 : index
    %c0_43 = arith.constant 0 : index
    %132 = vector.load %arg9[%c0_42, %c0_43] : memref<1x32xf32, #tpu.memory_space<vmem>>, vector<1x32xf32>
    %c0_44 = arith.constant 0 : index
    %c0_45 = arith.constant 0 : index
    %133 = vector.load %arg10[%c0_44, %c0_45] : memref<1x32xf32, #tpu.memory_space<vmem>>, vector<1x32xf32>
    %cst_46 = arith.constant dense<0.000000e+00> : vector<8xf32>
    %134 = vector.multi_reduction <add>, %131, %cst_46 [1] : vector<8x32xf32> to vector<8xf32>
    %135 = vector.shape_cast %134 : vector<8xf32> to vector<8x1xf32>
    %cst_47 = arith.constant 3.200000e+01 : f32
    %136 = vector.broadcast %cst_47 : f32 to vector<8x1xf32>
    %137 = arith.divf %135, %136 : vector<8x1xf32>
    %138 = vector.broadcast %137 : vector<8x1xf32> to vector<8x32xf32>
    %139 = arith.subf %131, %138 : vector<8x32xf32>
    %140 = arith.mulf %139, %139 : vector<8x32xf32>
    %cst_48 = arith.constant dense<0.000000e+00> : vector<8xf32>
    %141 = vector.multi_reduction <add>, %140, %cst_48 [1] : vector<8x32xf32> to vector<8xf32>
    %142 = vector.shape_cast %141 : vector<8xf32> to vector<8x1xf32>
    %cst_49 = arith.constant 3.200000e+01 : f32
    %143 = vector.broadcast %cst_49 : f32 to vector<8x1xf32>
    %144 = arith.divf %142, %143 : vector<8x1xf32>
    %145 = vector.broadcast %137 : vector<8x1xf32> to vector<8x32xf32>
    %146 = arith.subf %131, %145 : vector<8x32xf32>
    %cst_50 = arith.constant 9.99999974E-6 : f32
    %147 = vector.broadcast %cst_50 : f32 to vector<8x1xf32>
    %148 = arith.addf %144, %147 : vector<8x1xf32>
    %149 = math.rsqrt %148 : vector<8x1xf32>
    %150 = vector.broadcast %149 : vector<8x1xf32> to vector<8x32xf32>
    %151 = arith.mulf %146, %150 : vector<8x32xf32>
    %152 = vector.broadcast %132 : vector<1x32xf32> to vector<8x32xf32>
    %153 = arith.mulf %151, %152 : vector<8x32xf32>
    %154 = vector.broadcast %133 : vector<1x32xf32> to vector<8x32xf32>
    %155 = arith.addf %153, %154 : vector<8x32xf32>
    %156 = arith.truncf %155 : vector<8x32xf32> to vector<8x32xbf16>
    %c0_51 = arith.constant 0 : index
    %c0_52 = arith.constant 0 : index
    %157 = vector.load %arg11[%c0_51, %c0_52] : memref<32x128xbf16, #tpu.memory_space<vmem>>, vector<32x128xbf16>
    %cst_53 = arith.constant dense<0.000000e+00> : vector<8x128xf32>
    %158 = tpu.matmul %156, %157, %cst_53 {dimension_numbers = #tpu.dot_dimension_numbers<[1], [0], [0], [1], [0, 0, 1, 1], [], []>} : vector<8x32xbf16>, vector<32x128xbf16>, vector<8x128xf32> -> vector<8x128xf32>
    %c0_54 = arith.constant 0 : index
    %c0_55 = arith.constant 0 : index
    %159 = vector.load %arg12[%c0_54, %c0_55] : memref<1x128xf32, #tpu.memory_space<vmem>>, vector<1x128xf32>
    %160 = vector.broadcast %159 : vector<1x128xf32> to vector<8x128xf32>
    %161 = arith.addf %158, %160 : vector<8x128xf32>
    %cst_56 = arith.constant 1.702000e+00 : f32
    %162 = vector.broadcast %cst_56 : f32 to vector<8x128xf32>
    %163 = arith.mulf %162, %161 : vector<8x128xf32>
    %164 = arith.negf %163 : vector<8x128xf32>
    %165 = math.exp %164 : vector<8x128xf32>
    %cst_57 = arith.constant 1.000000e+00 : f32
    %166 = vector.broadcast %cst_57 : f32 to vector<8x128xf32>
    %167 = arith.addf %166, %165 : vector<8x128xf32>
    %168 = arith.divf %166, %167 : vector<8x128xf32>
    %169 = arith.mulf %161, %168 : vector<8x128xf32>
    %170 = arith.truncf %169 : vector<8x128xf32> to vector<8x128xbf16>
    %c0_58 = arith.constant 0 : index
    %c0_59 = arith.constant 0 : index
    %171 = vector.load %arg13[%c0_58, %c0_59] : memref<128x32xbf16, #tpu.memory_space<vmem>>, vector<128x32xbf16>
    %cst_60 = arith.constant dense<0.000000e+00> : vector<8x32xf32>
    %172 = tpu.matmul %170, %171, %cst_60 {dimension_numbers = #tpu.dot_dimension_numbers<[1], [0], [0], [1], [0, 0, 1, 1], [], []>} : vector<8x128xbf16>, vector<128x32xbf16>, vector<8x32xf32> -> vector<8x32xf32>
    %c0_61 = arith.constant 0 : index
    %c0_62 = arith.constant 0 : index
    %173 = vector.load %arg14[%c0_61, %c0_62] : memref<1x32xf32, #tpu.memory_space<vmem>>, vector<1x32xf32>
    %174 = vector.broadcast %173 : vector<1x32xf32> to vector<8x32xf32>
    %175 = arith.addf %172, %174 : vector<8x32xf32>
    %176 = arith.addf %131, %175 : vector<8x32xf32>
    %c0_63 = arith.constant 0 : index
    %c0_64 = arith.constant 0 : index
    %c0_65 = arith.constant 0 : index
    %177 = vector.load %arg15[%c0_63, %c0_64, %c0_65] : memref<1x8x32xf32, #tpu.memory_space<vmem>>, vector<1x8x32xf32>
    %178 = vector.shape_cast %177 : vector<1x8x32xf32> to vector<8x32xf32>
    %179 = vector.shape_cast %176 : vector<8x32xf32> to vector<1x8x32xf32>
    tpu.vector_store %arg15[%c0_63, %c0_64, %c0_65], %179 {strides = array<i32>} : memref<1x8x32xf32, #tpu.memory_space<vmem>>, vector<1x8x32xf32>,
    return
  }
  func.func @transform_0(%arg0: i32) -> (i32, i32, i32) {
    %c0_i32 = arith.constant 0 : i32
    %c0_i32_0 = arith.constant 0 : i32
    %c0_i32_1 = arith.constant 0 : i32
    return %arg0, %c0_i32, %c0_i32_0 : i32, i32, i32
  }
  func.func @transform_1(%arg0: i32) -> (i32, i32) {
    %c0_i32 = arith.constant 0 : i32
    %c0_i32_0 = arith.constant 0 : i32
    %c0_i32_1 = arith.constant 0 : i32
    return %c0_i32, %c0_i32_0 : i32, i32
  }
  func.func @transform_2(%arg0: i32) -> (i32, i32) {
    %c0_i32 = arith.constant 0 : i32
    %c0_i32_0 = arith.constant 0 : i32
    %c0_i32_1 = arith.constant 0 : i32
    return %c0_i32, %c0_i32_0 : i32, i32
  }
  func.func @transform_3(%arg0: i32) -> (i32, i32) {
    %c0_i32 = arith.constant 0 : i32
    %c0_i32_0 = arith.constant 0 : i32
    %c0_i32_1 = arith.constant 0 : i32
    return %c0_i32, %c0_i32_0 : i32, i32
  }
  func.func @transform_4(%arg0: i32) -> (i32, i32) {
    %c0_i32 = arith.constant 0 : i32
    %c0_i32_0 = arith.constant 0 : i32
    %c0_i32_1 = arith.constant 0 : i32
    return %c0_i32, %c0_i32_0 : i32, i32
  }
  func.func @transform_5(%arg0: i32) -> (i32, i32) {
    %c0_i32 = arith.constant 0 : i32
    %c0_i32_0 = arith.constant 0 : i32
    %c0_i32_1 = arith.constant 0 : i32
    return %c0_i32, %c0_i32_0 : i32, i32
  }
  func.func @transform_6(%arg0: i32) -> (i32, i32) {
    %c0_i32 = arith.constant 0 : i32
    %c0_i32_0 = arith.constant 0 : i32
    %c0_i32_1 = arith.constant 0 : i32
    return %c0_i32, %c0_i32_0 : i32, i32
  }
  func.func @transform_7(%arg0: i32) -> (i32, i32) {
    %c0_i32 = arith.constant 0 : i32
    %c0_i32_0 = arith.constant 0 : i32
    %c0_i32_1 = arith.constant 0 : i32
    return %c0_i32, %c0_i32_0 : i32, i32
  }
  func.func @transform_8(%arg0: i32) -> (i32, i32) {
    %c0_i32 = arith.constant 0 : i32
    %c0_i32_0 = arith.constant 0 : i32
    %c0_i32_1 = arith.constant 0 : i32
    return %c0_i32, %c0_i32_0 : i32, i32
  }
  func.func @transform_9(%arg0: i32) -> (i32, i32) {
    %c0_i32 = arith.constant 0 : i32
    %c0_i32_0 = arith.constant 0 : i32
    %c0_i32_1 = arith.constant 0 : i32
    return %c0_i32, %c0_i32_0 : i32, i32
  }
  func.func @transform_10(%arg0: i32) -> (i32, i32) {
    %c0_i32 = arith.constant 0 : i32
    %c0_i32_0 = arith.constant 0 : i32
    %c0_i32_1 = arith.constant 0 : i32
    return %c0_i32, %c0_i32_0 : i32, i32
  }
  func.func @transform_11(%arg0: i32) -> (i32, i32) {
    %c0_i32 = arith.constant 0 : i32
    %c0_i32_0 = arith.constant 0 : i32
    %c0_i32_1 = arith.constant 0 : i32
    return %c0_i32, %c0_i32_0 : i32, i32
  }
  func.func @transform_12(%arg0: i32) -> (i32, i32) {
    %c0_i32 = arith.constant 0 : i32
    %c0_i32_0 = arith.constant 0 : i32
    %c0_i32_1 = arith.constant 0 : i32
    return %c0_i32, %c0_i32_0 : i32, i32
  }
  func.func @transform_13(%arg0: i32) -> (i32, i32) {
    %c0_i32 = arith.constant 0 : i32
    %c0_i32_0 = arith.constant 0 : i32
    %c0_i32_1 = arith.constant 0 : i32
    return %c0_i32, %c0_i32_0 : i32, i32
  }
  func.func @transform_14(%arg0: i32) -> (i32, i32, i32) {
    %c0_i32 = arith.constant 0 : i32
    %c0_i32_0 = arith.constant 0 : i32
    %c0_i32_1 = arith.constant 0 : i32
    return %arg0, %c0_i32, %c0_i32_0 : i32, i32, i32
  }
}

</mosaic_0001>

<bundles_post_ra>
// kernel: frozen_clip_embedder_forward.5
= control target key start
LH: loop header
LB: loop body
LE: loop exit
PB: predicated region body
PF: predicated region fallthrough
CT: control target
= control target key end

     0   :  { %8 = vsyncpa [#allocation3], 0  ;;  %s518_s0 = inlined_call_operand.vmem [shape: f32[2,8,32], index: 0, kind: input, shape index: {}]   ;;  %s519_s1 = inlined_call_operand.vmem [shape: f32[1,32], index: 1, kind: input, shape index: {}]   ;;  %s520_s2 = inlined_call_operand.vmem [shape: f32[1,32], index: 2, kind: input, shape index: {}]   ;;  %s521_s3 = inlined_call_operand.hbm [shape: f32[2,8,32], index: 3, kind: output, shape index: {}]  }
   0x1   :  { %10 = vsyncpa [#allocation3 + $0x1], 0  ;;  %s424_s12 = smov 0   ;;  %s426_s13 = smov 0  }
   0x2   :  { %s428_s14 = smov 0   ;;  %s430_s15 = smov 0  }
   0x3 LB: > { %s445_s16 = sadd.s32 4294967295, %s401_s15   ;;  %s283_s17 = sadd.s32 4294967294, %s401_s15   ;;  %s401_s15 = sphi %s430_s15, %s527_s15   ;;  %s397_s14 = sphi %s428_s14, %s526_s14   ;;  %s393_s13 = sphi %s426_s13, %s525_s13   ;;  %s389_s12 = sphi %s424_s12, %s524_s12  }
   0x4   : > { %s449_s18 = sadd.s32 1, %s401_s15   ;;  %s91_s19 = sadd.s32 1, %s397_s14 }
   0x5   : > { %s88_s20 = ssub.s32 %s401_s15, %s449_s18  ;;  %p101_p0 = scmp.ne.s32.totalorder %s397_s14, %s393_s13 }
   0x6   : > { %p89_p1 = scmp.eq.s32.totalorder %s88_s20, 0  ;;  %p102_p2 = scmp.eq.s32.totalorder %s445_s16, 1 }
   0x7   : > { %p107_p3 = scmp.ne.s32.totalorder %s393_s13, %s389_s12  ;;  %p108_p4 = scmp.eq.s32.totalorder %s283_s17, 1 }
   0x8   : > { %s460_s21 = scalar_select %p89_p1, %s397_s14, %s91_s19  }
   0x9   : > { %p462_p5 = por %p102_p2, %p101_p0  ;;  %p466_p6 = por %p108_p4, %p107_p3 }
   0xa   : > { %p286_p7 = scmp.ge.s32.totalorder %s401_s15, 1  ;;  %p139_p8 = scmp.lt.s32.totalorder %s401_s15, 3 }
   0xc   : > { %p140_p9 = pnand %p286_p7, %p139_p8 }
   0xd   : > { %p162_p10 = scmp.lt.s32.totalorder (!%p140_p9), %s445_s16, 1  ;;  %s159_s29 = sand.u32 (!%p140_p9), 1, %s393_s13  }
   0xe   : > { %143 = sbr.rel (%p140_p9) target bundleno = 295 (0x127), region = 32  ;;  %s287_s30 = sshll.u32 (!%p140_p9), %s159_s29, 3 }
   0xf   : > { %s290_s4 = sshll.u32 (!%p140_p9), %s445_s16, 3  ;;  %s161_s17 = scalar_lea.vmem (!%p140_p9), [#allocation2], %s287_s30 }
  0x10   : > { %s219_s9 = scalar_lea.hbm (!%p140_p9), %s521_s3, %s290_s4  ;;  %s209_s20 = scalar_lea.sflag (!%p140_p9), [#allocation3], %s159_s29 }
  0x11   : > { %s223_s19 = sshll.u32 (!%p140_p9), %s219_s9, 4  ;;  %s224_s19 = int_to_ptr.hbm [resolvable:$true] %s223_s19 }
  0x13   : > { %s163_s24 = scalar_select %p162_p10, %s445_s16, 1  ;;  %vm169_vm0 = vcmask 261120   ;;  %v403_v2 = vmov 32.0   ;;  %v333_v23 = vld [vmem:[%s519_s1] ss:$0 sm:$0xff] }
  0x14   : > { %335 = vrcp.f32 %v403_v2  ;;  %v334_v26 = vld [vmem:[%s520_s2] ss:$0 sm:$0xff]  ;;  %s221_s16 = sshll.u32 %s161_s17, 4  ;;  %s222_s16 = int_to_ptr.vmem [resolvable:$true] %s221_s16 }
  0x15   : > { %s288_s25 = sshll.u32 %s163_s24, 3  ;;  %s353_s24 = sshra.s32 %s224_s19, 4  ;;  %s354_s24 = int_to_ptr.hbm [resolvable:$true] %s353_s24 }
  0x16   : > { %s165_s28 = scalar_lea.vmem %s518_s0, %s288_s25  ;;  %s355_s25 = scalar_lea.hbm %s354_s24, 8 }
  0x17   : > { %v166_v0 = vld [vmem:[%s165_s28] sm:$0xff]  ;;  %p356_p11 = scmp.ne.s32.totalorder %s354_s24, %s355_s25  ;;  %s359_s28 = scalar_lea.hbm %s521_s3, 16 }
  0x18   : > { %v170_v1 = vsel %vm169_vm0, %v166_v0, 0.0  ;;  %p360_p0 = scmp.lt.s32.totalorder %s354_s24, %s521_s3  ;;  %p361_p1 = scmp.lt.s32.totalorder %s359_s28, %s355_s25 }
  0x19   : > { %171 = vadd.xlane.f32.xlu0 %v170_v1  ;;  %p357_p12 = pnand %p356_p11, %p462_p5 }
  0x1a   : > { %v336_v3 = vpop.eup %335  ;;  %p362_p2 = por %p361_p1, %p360_p0 }
  0x1b   : > { %v174_v4 = vmul.f32 32.0, %v336_v3  ;;  %vm178_vm1 = vweird.f32 %v336_v3  ;;  %p358_p13 = pneg %p357_p12 }
  0x1d   : > { %v175_v5 = vsub.f32 1.0, %v174_v4  ;;  %p363_p3 = pnand %p362_p2, %p358_p13 }
  0x1f   : > { %v176_v6 = vmul.f32 %v336_v3, %v175_v5 }
  0x21   : > { %v177_v7 = vadd.f32 %v336_v3, %v176_v6 }
  0x23   : > { %v179_v8 = vsel %vm178_vm1, %v336_v3, %v177_v7 }
  0x8c   : > { %v172_v9 = vpop.xlane.xlu0 %171 }
  0x8d   : > { %v180_v10 = vmul.f32 %v179_v8, %v172_v9 }
  0x8f   : > { %v181_v11 = vsub.f32 %v166_v0, %v180_v10 }
  0x91   : > { %v182_v12 = vmul.f32 %v181_v11, %v181_v11 }
  0x93   : > { %v183_v13 = vsel %vm169_vm0, %v182_v12, 0.0 }
  0x94   : > { %184 = vadd.xlane.f32.xlu0 %v183_v13 }
 0x107   : > { %v185_v14 = vpop.xlane.xlu0 %184 }
 0x108   : > { %v186_v15 = vmul.f32 %v185_v14, %v179_v8 }
 0x10a   : > { %v187_v16 = vadd.f32 1e-05, %v186_v15 }
 0x10c   : > { %337 = vrsqrt.f32 %v187_v16  ;;  %vm194_vm3 = vweird.f32 %v187_v16 }
 0x112   : > { %v338_v17 = vpop.eup %337 }
 0x113   : > { %v189_v18 = vmul.f32 %v338_v17, %v187_v16  ;;  %vm195_vm2 = vweird.f32 %v338_v17 }
 0x114   : > { %vm196_vm4 = vmor %vm194_vm3, %vm195_vm2 }
 0x115   : > { %v190_v19 = vmul.f32 %v338_v17, %v189_v18 }
 0x117   : > { %v191_v20 = vmul.f32 0.5, %v190_v19 }
 0x119   : > { %v192_v21 = vsub.f32 1.5, %v191_v20 }
 0x11b   : > { %v193_v22 = vmul.f32 %v338_v17, %v192_v21 }
 0x11d   : > { %v197_v24 = vsel %vm196_vm4, %v338_v17, %v193_v22 }
 0x11e   : > { %v198_v25 = vmul.f32 %v197_v24, %v181_v11 }
 0x120   : > { %v202_v27 = vmul.f32 %v333_v23, %v198_v25 }
 0x122   : > { %v206_v28 = vadd.f32 %v334_v26, %v202_v27 }
 0x124   : > { %207 = vst.msk [vmem:[%s161_s17] sm:$0xff] %vm169_vm0, %v206_v28 }
 0x125   : > { %366 = shalt.err (!%p363_p3)
}
 0x126   : > { %293 = dma.vmem_to_hbm [thread:$0]  (%p462_p5), %s222_s16, 128, %s224_s19, %s209_s20  }
 0x127 PF: > { %p299_p4 = scmp.ge.s32.totalorder %s401_s15, 2  ;;  %s235_s29 = sand.u32 1, %s389_s12  }
 0x128   : > { %s236_s5 = scalar_lea.sflag [#allocation3], %s235_s29 }
 0x129   : > { %p296_p7 = pnand %p299_p4, %p466_p6 }
 0x12b   : > { %p297_p8 = pneg %p296_p7 }
 0x12d   : > { %384 = dma.done.wait (%p297_p8), %s236_s5, 128  }
 0x12e   : > { %386 = vsyncadd (%p297_p8), %s236_s5, 4294967168  ;;  %p13_p9 = scmp.ge.s32.totalorder %s449_s18, 4   ;;  %s524_s12 = smov %s393_s13 }
 0x12f   : > { %s525_s13 = smov %s397_s14  ;;  %s526_s14 = smov %s460_s21 }
 0x130   : > { %s527_s15 = smov %s449_s18  ;;  %15 = sbr.rel (!%p13_p9) target bundleno = 3 (0x3), region = 67 }
 0x135   :  { %242 = vsyncpa [#allocation3], 1 }
 0x136   :  { %244 = vsyncpa [#allocation3 + $0x1], 1 }

// kernel: frozen_clip_embedder_forward.3
= control target key start
LH: loop header
LB: loop body
LE: loop exit
PB: predicated region body
PF: predicated region fallthrough
CT: control target
= control target key end

     0   :  { %s1305_s29 = smov 0   ;;  %s1464_s0 = inlined_call_operand.vmem [shape: f32[2,8,32], index: 0, kind: input, shape index: {}, may-alias: {0,14}]   ;;  %s1465_s1 = inlined_call_operand.vmem [shape: f32[8,8], index: 1, kind: input, shape index: {}]   ;;  %s1466_s2 = inlined_call_operand.vmem [shape: f32[1,32], index: 2, kind: input, shape index: {}]   ;;  %s1467_s3 = inlined_call_operand.vmem [shape: f32[1,32], index: 3, kind: input, shape index: {}]   ;;  %s1468_s4 = inlined_call_operand.vmem [shape: bf16[32,96], index: 4, kind: input, shape index: {}]   ;;  %s1469_s5 = inlined_call_operand.vmem [shape: f32[1,96], index: 5, kind: input, shape index: {}]   ;;  %s1470_s6 = inlined_call_operand.vmem [shape: bf16[32,32], index: 6, kind: input, shape index: {}]   ;;  %s1471_s7 = inlined_call_operand.vmem [shape: f32[1,32], index: 7, kind: input, shape index: {}]   ;;  %s1472_s8 = inlined_call_operand.vmem [shape: f32[1,32], index: 8, kind: input, shape index: {}]   ;;  %s1473_s9 = inlined_call_operand.vmem [shape: f32[1,32], index: 9, kind: input, shape index: {}]   ;;  %s1474_s10 = inlined_call_operand.vmem [shape: bf16[32,128], index: 10, kind: input, shape index: {}]   ;;  %s1475_s11 = inlined_call_operand.vmem [shape: f32[1,128], index: 11, kind: input, shape index: {}]   ;;  %s1476_s12 = inlined_call_operand.vmem [shape: bf16[128,32], index: 12, kind: input, shape index: {}]   ;;  %s1477_s13 = inlined_call_operand.vmem [shape: f32[1,32], index: 13, kind: input, shape index: {}]   ;;  %s1478_s14 = inlined_call_operand.vmem [shape: f32[2,8,32], index: 14, kind: output, shape index: {}, may-alias: {0,14}]  }
   0x1 LB: > { %s1059_s30 = sadd.s32 4294967295, %s1213_s29   ;;  %p1063_p0 = scmp.ge.s32.totalorder %s1213_s29, 1  ;;  %s1213_s29 = sphi %s1305_s29, %s24_s29  }
   0x2   : > { %p411_p1 = scmp.lt.s32.totalorder %s1213_s29, 3 }
   0x4   : > { %p412_p2 = pnand %p1063_p0, %p411_p1 }
   0x5   : > { %p455_p3 = scmp.lt.s32.totalorder (!%p412_p2), %s1059_s30, 1  ;;  %s1216_s16 = smov (!%p412_p2), 88  }
   0x6   : > { %415 = sbr.rel (%p412_p2) target bundleno = 2328 (0x918), region = 76  ;;  %s1217_s17 = smov (!%p412_p2), 64  }
   0x7   : > { %s1219_s19 = smov (!%p412_p2), 72   ;;  %s1220_s20 = smov (!%p412_p2), 80  }
   0x8   : > { %s1221_s23 = smov (!%p412_p2), 120   ;;  %s1222_s24 = smov (!%p412_p2), 104  }
   0x9   : > { %s1223_s25 = smov (!%p412_p2), 112   ;;  %s1224_s26 = smov (!%p412_p2), 40  }
   0xa   : > { %s1225_s27 = smov (!%p412_p2), 48   ;;  %s1226_s28 = smov (!%p412_p2), 56  }
   0xb   : > { %s1480_s30 = smov (!%p455_p3, %s1059_s30), 1  ;;  %vm468_vm0 = vcmask 261120   ;;  %v1215_v2 = vmov 32.0   ;;  %v1137_v14 = vld [vmem:[%s1468_s4 + $0x8] sm:$0xff]  ;;  %v1136_v15 = vld [vmem:[%s1468_s4] sm:$0xff]  ;;  %vm586_vm5 = vcmask 1043456  }
   0xc   : > { %s1064_s15 = sshll.u32 %s1480_s30, 3  ;;  %1181 = vrcp.f32 %v1215_v2  ;;  %536 = vmatpush.bf16.msra.mxu0 %v1137_v14  ;;  %v1173_v25 = vld [vmem:[%s1466_s2] ss:$0 sm:$0xff]  ;;  %vm547_vm6 = vcmask 64512   ;;  %vm790_vm7 = vcmask 130048   ;;  %vm792_vm8 = vcmask 195584  }
   0xd   : > { %s458_s18 = scalar_lea.vmem %s1464_s0, %s1064_s15  ;;  %v1174_v28 = vld [vmem:[%s1467_s3] ss:$0 sm:$0xff] }
   0xe   : > { %v1321_v0 = vld [vmem:[%s458_s18] sm:$0xff]  ;;  %s1218_s18 = smov 96  }
   0xf   : > { %v469_v1 = vsel %vm468_vm0, %v1321_v0, 0.0  ;;  %v1175_v32 = vld [vmem:[%s1469_s5] ss:$0 sm:$0xff] }
  0x10   : > { %470 = vadd.xlane.f32.xlu0 %v469_v1  ;;  %537 = vmatpush.bf16.msra.mxu0 %v1136_v15  ;;  %v465_v48 = vld [vmem:[%s1465_s1] sm:$0xff] }
  0x12   : > { %v1182_v3 = vpop.eup %1181 }
  0x13   : > { %v473_v4 = vmul.f32 32.0, %v1182_v3  ;;  %vm477_vm1 = vweird.f32 %v1182_v3 }
  0x15   : > { %v474_v5 = vsub.f32 1.0, %v473_v4 }
  0x17   : > { %v475_v6 = vmul.f32 %v1182_v3, %v474_v5 }
  0x19   : > { %v476_v7 = vadd.f32 %v1182_v3, %v475_v6 }
  0x1b   : > { %v1325_v8 = vsel %vm477_vm1, %v1182_v3, %v476_v7 }
  0x83   : > { %v471_v9 = vpop.xlane.xlu0 %470 }
  0x84   : > { %v479_v10 = vmul.f32 %v1325_v8, %v471_v9 }
  0x86   : > { %v480_v11 = vsub.f32 %v1321_v0, %v479_v10 }
  0x88   : > { %v481_v12 = vmul.f32 %v480_v11, %v480_v11 }
  0x8a   : > { %v482_v13 = vsel %vm468_vm0, %v481_v12, 0.0 }
  0x8b   : > { %483 = vadd.xlane.f32.xlu0 %v482_v13 }
  0xfe   : > { %v484_v16 = vpop.xlane.xlu0 %483 }
  0xff   : > { %v485_v17 = vmul.f32 %v484_v16, %v1325_v8 }
 0x101   : > { %v486_v18 = vadd.f32 1e-05, %v485_v17 }
 0x103   : > { %1183 = vrsqrt.f32 %v486_v18  ;;  %vm493_vm3 = vweird.f32 %v486_v18 }
 0x109   : > { %v1184_v19 = vpop.eup %1183 }
 0x10a   : > { %v488_v20 = vmul.f32 %v1184_v19, %v486_v18  ;;  %vm494_vm2 = vweird.f32 %v1184_v19 }
 0x10b   : > { %vm495_vm4 = vmor %vm493_vm3, %vm494_vm2 }
 0x10c   : > { %v489_v21 = vmul.f32 %v1184_v19, %v488_v20 }
 0x10e   : > { %v490_v22 = vmul.f32 0.5, %v489_v21 }
 0x110   : > { %v491_v23 = vsub.f32 1.5, %v490_v22 }
 0x112   : > { %v492_v24 = vmul.f32 %v1184_v19, %v491_v23 }
 0x114   : > { %v496_v26 = vsel %vm495_vm4, %v1184_v19, %v492_v24 }
 0x115   : > { %v497_v27 = vmul.f32 %v496_v26, %v480_v11 }
 0x117   : > { %v501_v29 = vmul.f32 %v1173_v25, %v497_v27 }
 0x119   : > { %v505_v30 = vadd.f32 %v1174_v28, %v501_v29 }
 0x11b   : > { %v506_v31 = vpack.c.bf16 %v505_v30, %v505_v30 }
 0x11d   : > { %1074 = vmatmul.msk.bf16.vlgmr.msra.gmra.mxu0 %vm468_vm0, %v506_v31 }
 0x19a   : > { %v539_v33 = vpop.f32.mrf.mxu0 }
 0x19b   : > { %v540_v34 = vadd.f32 %v1175_v32, %v539_v33 }
 0x19d   : > { %v1347_v35 = vpack.c.bf16 %v540_v34, %v540_v34 }
 0x19f   : > { %605 = vrot.lane.b32.xlu0 %v1347_v35, %s1216_s16  ;;  %581 = vrot.lane.b32.xlu2 %v1347_v35, %s1217_s17  ;;  %s1227_s16 = smov 16   ;;  %s1228_s17 = smov 8  }
 0x1a0   : > { %545 = vrot.lane.b32.xlu1 %v1347_v35, %s1218_s18  ;;  %s1229_s18 = smov 24  }
 0x1a2   : > { %v541_v36 = vpop.f32.mrf.mxu0 }
 0x1a7   : > { %721 = vrot.lane.b32.xlu0 %v1347_v35, %s1219_s19 }
 0x1af   : > { %663 = vrot.lane.b32.xlu0 %v1347_v35, %s1220_s20 }
 0x1f9   : > { %v582_v37 = vpop.permute.xlu2 %581 }
 0x1fa   : > { %v588_v38 = vsel %vm586_vm5, %v582_v37, 0 }
 0x1fb   : > { %597 = vmatpush.bf16.msra.mxu2 %v588_v38 }
 0x211   : > { %v606_v39 = vpop.permute.xlu0 %605 }
 0x212   : > { %v546_v40 = vpop.permute.xlu1 %545  ;;  %v611_v41 = vsel %vm547_vm6, %v606_v39, 0 }
 0x213   : > { %v552_v42 = vsel %vm547_vm6, %v546_v40, 0  ;;  %620 = vmatpush.bf16.xpose.msrb.mxu2 %v611_v41 }
 0x214   : > { %561 = vmatpush.bf16.xpose.msra.mxu1 %v552_v42 }
 0x219   : > { %v722_v43 = vpop.permute.xlu0 %721 }
 0x21a   : > { %v727_v44 = vsel %vm547_vm6, %v722_v43, 0 }
 0x21b   : > { %1075 = vmatmul.msk.bf16.vlgmr.msra.gmra.mxu1 %vm547_vm6, %v1347_v35  ;;  %736 = vmatpush.bf16.xpose.msra.mxu3 %v727_v44 }
 0x221   : > { %v664_v45 = vpop.permute.xlu0 %663 }
 0x222   : > { %v669_v46 = vsel %vm547_vm6, %v664_v45, 0 }
 0x223   : > { %678 = vmatpush.bf16.xpose.msrb.mxu0 %v669_v46 }
 0x298   : > { %v563_v47 = vpop.f32.mrf.mxu1 }
 0x299   : > { %v567_v49 = vmul.f32 0.35355338, %v563_v47 }
 0x29b   : > { %v568_v50 = vadd.f32 %v567_v49, %v465_v48 }
 0x29d   : > { %v569_v51 = vsel %vm547_vm6, %v568_v50, -inf }
 0x29e   : > { %570 = vmax.xlane.f32.xlu1 %v569_v51 }
 0x2a0   : > { %v565_v52 = vpop.f32.mrf.mxu1 }
 0x311   : > { %v571_v53 = vpop.xlane.xlu1 %570 }
 0x312   : > { %v572_v54 = vsub.f32 %v568_v50, %v571_v53 }
 0x314   : > { %v573_v55 = vmul.f32 1.442695, %v572_v54 }
 0x316   : > { %1185 = vpow2.f32 %v573_v55 }
 0x31c   : > { %v1186_v56 = vpop.eup %1185 }
 0x31d   : > { %v575_v57 = vsel %vm547_vm6, %v1186_v56, 0.0 }
 0x31e   : > { %576 = vadd.xlane.f32.xlu2 %v575_v57 }
 0x336   : > { %603 = vrot.lane.b32.xlu2 %v1347_v35, %s1221_s23 }
 0x33e   : > { %719 = vrot.lane.b32.xlu2 %v1347_v35, %s1222_s24 }
 0x346   : > { %661 = vrot.lane.b32.xlu2 %v1347_v35, %s1223_s25 }
 0x391   : > { %v577_v58 = vpop.xlane.xlu2 %576 }
 0x392   : > { %1187 = vrcp.f32 %v577_v58 }
 0x398   : > { %v1188_v59 = vpop.eup %1187 }
 0x399   : > { %v604_v60 = vpop.permute.xlu2 %603  ;;  %v579_v61 = vmul.f32 %v1188_v59, %v1186_v56  ;;  %v1139_v59 = vld [vmem:[%s1470_s6 + $0x8] sm:$0xff] }
 0x39a   : > { %824 = vmatpush.bf16.msra.mxu0 %v1139_v59 }
 0x39b   : > { %v580_v62 = vpack.c.bf16 %v579_v61, %v579_v61 }
 0x39d   : > { %1076 = vmatmul.msk.bf16.vlgmr.msra.gmra.mxu2 %vm547_vm6, %v580_v62 }
 0x3a1   : > { %v720_v63 = vpop.permute.xlu2 %719 }
 0x3a2   : > { %1081 = vmatmul.msk.bf16.vlgmr.msra.gmra.mxu3 %vm547_vm6, %v720_v63 }
 0x3a9   : > { %v662_v1 = vpop.permute.xlu2 %661 }
 0x3aa   : > { %1079 = vmatmul.msk.bf16.vlgmr.msrb.gmra.mxu0 %vm547_vm6, %v662_v1 }
 0x3ad   : > { %1077 = vmatmul.msk.bf16.vlgmr.msrb.gmra.mxu2 %vm547_vm6, %v604_v60  ;;  %v1138_v60 = vld [vmem:[%s1470_s6] sm:$0xff] }
 0x3ae   : > { %825 = vmatpush.bf16.msra.mxu0 %v1138_v60 }
 0x420   : > { %v1373_v2 = vpop.f32.mrf.mxu2 }
 0x425   : > { %v738_v3 = vpop.f32.mrf.mxu3 }
 0x426   : > { %v742_v4 = vmul.f32 0.35355338, %v738_v3 }
 0x427   : > { %v680_v5 = vpop.f32.mrf.mxu0 }
 0x428   : > { %v684_v6 = vmul.f32 0.35355338, %v680_v5  ;;  %v601_v7 = vpop.f32.mrf.mxu2  ;;  %v743_v9 = vadd.f32 %v742_v4, %v465_v48 }
 0x42a   : > { %v744_v10 = vsel %vm547_vm6, %v743_v9, -inf  ;;  %v685_v11 = vadd.f32 %v684_v6, %v465_v48  ;;  %v1176_v6 = vld [vmem:[%s1471_s7] ss:$0 sm:$0xff] }
 0x42b   : > { %745 = vmax.xlane.f32.xlu0 %v744_v10 }
 0x42c   : > { %v686_v12 = vsel %vm547_vm6, %v685_v11, -inf }
 0x42d   : > { %v740_v13 = vpop.f32.mrf.mxu3  ;;  %687 = vmax.xlane.f32.xlu2 %v686_v12 }
 0x42f   : > { %v682_v14 = vpop.f32.mrf.mxu0 }
 0x430   : > { %v622_v15 = vpop.f32.mrf.mxu2 }
 0x431   : > { %v626_v16 = vmul.f32 0.35355338, %v622_v15 }
 0x433   : > { %v627_v17 = vadd.f32 %v626_v16, %v465_v48 }
 0x435   : > { %v628_v18 = vsel %vm547_vm6, %v627_v17, -inf }
 0x436   : > { %629 = vmax.xlane.f32.xlu1 %v628_v18 }
 0x438   : > { %v624_v19 = vpop.f32.mrf.mxu2 }
 0x445   : > { %756 = vrot.lane.b32.xlu2 %v1347_v35, %s1224_s26 }
 0x49e   : > { %v746_v30 = vpop.xlane.xlu0 %745 }
 0x49f   : > { %v747_v31 = vsub.f32 %v743_v9, %v746_v30 }
 0x4a0   : > { %v688_v20 = vpop.xlane.xlu2 %687 }
 0x4a1   : > { %v689_v21 = vsub.f32 %v685_v11, %v688_v20  ;;  %v748_v32 = vmul.f32 1.442695, %v747_v31 }
 0x4a3   : > { %v690_v22 = vmul.f32 1.442695, %v689_v21 }
 0x4a5   : > { %1189 = vpow2.f32 %v690_v22 }
 0x4a8   : > { %v757_v43 = vpop.permute.xlu2 %756 }
 0x4a9   : > { %v630_v23 = vpop.xlane.xlu1 %629  ;;  %v762_v47 = vsel %vm586_vm5, %v757_v43, 0 }
 0x4aa   : > { %v631_v24 = vsub.f32 %v627_v17, %v630_v23  ;;  %v1141_v17 = vld [vmem:[%s1474_s10 + $0x8] sm:$0xff] }
 0x4ab   : > { %v1190_v25 = vpop.eup %1189 }
 0x4ac   : > { %v632_v26 = vmul.f32 1.442695, %v631_v24  ;;  %v692_v27 = vsel %vm547_vm6, %v1190_v25, 0.0 }
 0x4ad   : > { %693 = vadd.xlane.f32.xlu0 %v692_v27  ;;  %v1177_v27 = vld [vmem:[%s1472_s8] ss:$0 sm:$0xff] }
 0x4ae   : > { %1191 = vpow2.f32 %v632_v26 }
 0x4af   : > { %1193 = vpow2.f32 %v748_v32 }
 0x4b4   : > { %v1192_v28 = vpop.eup %1191 }
 0x4b5   : > { %v634_v29 = vsel %vm547_vm6, %v1192_v28, 0.0  ;;  %v1194_v33 = vpop.eup %1193 }
 0x4b6   : > { %635 = vadd.xlane.f32.xlu1 %v634_v29  ;;  %v750_v34 = vsel %vm547_vm6, %v1194_v33, 0.0 }
 0x4c1   : > { %698 = vrot.lane.b32.xlu0 %v1347_v35, %s1225_s27 }
 0x4cf   : > { %640 = vrot.lane.b32.xlu1 %v1347_v35, %s1226_s28 }
 0x4f9   : > { %751 = vadd.xlane.f32.xlu1 %v750_v34  ;;  %v1148_v34 = vld [vmem:[%s1476_s12 + $0x30] sm:$0xff] }
 0x520   : > { %v694_v36 = vpop.xlane.xlu0 %693 }
 0x521   : > { %1195 = vrcp.f32 %v694_v36  ;;  %v1147_v36 = vld [vmem:[%s1476_s12 + $0x28] sm:$0xff] }
 0x527   : > { %v1196_v37 = vpop.eup %1195 }
 0x528   : > { %v696_v38 = vmul.f32 %v1196_v37, %v1190_v25  ;;  %v1146_v37 = vld [vmem:[%s1476_s12 + $0x20] sm:$0xff] }
 0x529   : > { %v636_v40 = vpop.xlane.xlu1 %635 }
 0x52a   : > { %v697_v42 = vpack.c.bf16 %v696_v38, %v696_v38  ;;  %1197 = vrcp.f32 %v636_v40  ;;  %v1145_v38 = vld [vmem:[%s1476_s12 + $0x18] sm:$0xff]  ;;  %v1143_v40 = vld [vmem:[%s1476_s12 + $0x8] sm:$0xff] }
 0x530   : > { %v1198_v35 = vpop.eup %1197 }
 0x531   : > { %v638_v44 = vmul.f32 %v1198_v35, %v1192_v28  ;;  %v1142_v35 = vld [vmem:[%s1476_s12] sm:$0xff] }
 0x533   : > { %v699_v39 = vpop.permute.xlu0 %698  ;;  %v639_v48 = vpack.c.bf16 %v638_v44, %v638_v44 }
 0x534   : > { %v704_v41 = vsel %vm586_vm5, %v699_v39, 0  ;;  %v1144_v39 = vld [vmem:[%s1476_s12 + $0x10] sm:$0xff] }
 0x535   : > { %713 = vmatpush.bf16.msrb.mxu1 %v704_v41  ;;  %v1179_v41 = vld [vmem:[%s1475_s11] ss:$0 sm:$0xff] }
 0x538   : > { %1080 = vmatmul.msk.bf16.vlgmr.msrb.gmra.mxu1 %vm547_vm6, %v697_v42 }
 0x539   : > { %894 = vmatpush.bf16.msra.mxu1 %v1141_v17 }
 0x541   : > { %v641_v45 = vpop.permute.xlu1 %640 }
 0x542   : > { %v646_v46 = vsel %vm586_vm5, %v641_v45, 0 }
 0x543   : > { %655 = vmatpush.bf16.msra.mxu2 %v646_v46 }
 0x546   : > { %1078 = vmatmul.msk.bf16.vlgmr.msra.gmra.mxu2 %vm547_vm6, %v639_v48 }
 0x547   : > { %771 = vmatpush.bf16.msrb.mxu2 %v762_v47 }
 0x56c   : > { %v752_v49 = vpop.xlane.xlu1 %751 }
 0x56d   : > { %1199 = vrcp.f32 %v752_v49 }
 0x573   : > { %v1200_v50 = vpop.eup %1199 }
 0x574   : > { %v754_v51 = vmul.f32 %v1200_v50, %v1194_v33  ;;  %v1149_v33 = vld [vmem:[%s1476_s12 + $0x38] sm:$0xff] }
 0x575   : > { %991 = vmatpush.bf16.msrb.mxu3 %v1149_v33 }
 0x576   : > { %v755_v52 = vpack.c.bf16 %v754_v51, %v754_v51 }
 0x578   : > { %1082 = vmatmul.msk.bf16.vlgmr.msrb.gmra.mxu2 %vm547_vm6, %v755_v52 }
 0x579   : > { %992 = vmatpush.bf16.msrb.mxu3 %v1148_v34 }
 0x57d   : > { %993 = vmatpush.bf16.msrb.mxu3 %v1147_v36 }
 0x581   : > { %994 = vmatpush.bf16.msrb.mxu3 %v1146_v37 }
 0x585   : > { %995 = vmatpush.bf16.msrb.mxu3 %v1145_v38 }
 0x589   : > { %996 = vmatpush.bf16.msrb.mxu3 %v1144_v39 }
 0x58d   : > { %997 = vmatpush.bf16.msrb.mxu3 %v1143_v40 }
 0x591   : > { %998 = vmatpush.bf16.msrb.mxu3 %v1142_v35 }
 0x5b5   : > { %v715_v53 = vpop.f32.mrf.mxu1 }
 0x5b6   : > { %782 = vrot.lane.b32.xlu0 %v715_v53, %s1227_s16  ;;  %s462_s16 = scalar_lea.vmem %s1478_s14, %s1064_s15 }
 0x5bd   : > { %v717_v54 = vpop.f32.mrf.mxu1 }
 0x5c9   : > { %v657_v55 = vpop.f32.mrf.mxu2 }
 0x5ca   : > { %778 = vrot.lane.b32.xlu2 %v657_v55, %s1228_s17 }
 0x5d1   : > { %v659_v56 = vpop.f32.mrf.mxu2 }
 0x5fb   : > { %v773_v57 = vpop.f32.mrf.mxu2 }
 0x5fc   : > { %786 = vrot.lane.b32.xlu2 %v773_v57, %s1229_s18 }
 0x603   : > { %v775_v58 = vpop.f32.mrf.mxu2 }
 0x624   : > { %v779_v61 = vpop.permute.xlu2 %778 }
 0x625   : > { %v789_v63 = vsel %vm547_vm6, %v1373_v2, %v779_v61  ;;  %v1180_v61 = vld [vmem:[%s1477_s13] ss:$0 sm:$0xff] }
 0x628   : > { %v783_v62 = vpop.permute.xlu0 %782 }
 0x629   : > { %v791_v1 = vsel %vm790_vm7, %v789_v63, %v783_v62 }
 0x656   : > { %v787_v3 = vpop.permute.xlu2 %786 }
 0x657   : > { %v793_v4 = vsel %vm792_vm8, %v791_v1, %v787_v3 }
 0x658   : > { %v794_v5 = vpack.c.bf16 %v793_v4, %v793_v4 }
 0x65a   : > { %1091 = vmatmul.msk.bf16.vlgmr.msra.gmra.mxu0 %vm468_vm0, %v794_v5 }
 0x6d7   : > { %v827_v7 = vpop.f32.mrf.mxu0 }
 0x6d8   : > { %v828_v9 = vadd.f32 %v1176_v6, %v827_v7 }
 0x6da   : > { %v1403_v10 = vadd.f32 %v828_v9, %v1321_v0  ;;  %v1140_v0 = vld [vmem:[%s1474_s10] sm:$0xff] }
 0x6db   : > { %895 = vmatpush.bf16.msra.mxu1 %v1140_v0 }
 0x6dc   : > { %v834_v11 = vsel %vm468_vm0, %v1403_v10, 0.0 }
 0x6dd   : > { %835 = vadd.xlane.f32.xlu0 %v834_v11 }
 0x6df   : > { %v829_v2 = vpop.f32.mrf.mxu0 }
 0x750   : > { %v836_v12 = vpop.xlane.xlu0 %835 }
 0x751   : > { %v837_v13 = vmul.f32 %v836_v12, %v1325_v8 }
 0x753   : > { %v838_v14 = vsub.f32 %v1403_v10, %v837_v13 }
 0x755   : > { %v839_v15 = vmul.f32 %v838_v14, %v838_v14 }
 0x757   : > { %v840_v16 = vsel %vm468_vm0, %v839_v15, 0.0 }
 0x758   : > { %841 = vadd.xlane.f32.xlu1 %v840_v16 }
 0x7cb   : > { %v842_v18 = vpop.xlane.xlu1 %841 }
 0x7cc   : > { %v843_v19 = vmul.f32 %v842_v18, %v1325_v8  ;;  %v1178_v8 = vld [vmem:[%s1473_s9] ss:$0 sm:$0xff] }
 0x7ce   : > { %v844_v20 = vadd.f32 1e-05, %v843_v19 }
 0x7d0   : > { %1201 = vrsqrt.f32 %v844_v20  ;;  %vm851_vm10 = vweird.f32 %v844_v20 }
 0x7d6   : > { %v1202_v21 = vpop.eup %1201 }
 0x7d7   : > { %v846_v22 = vmul.f32 %v1202_v21, %v844_v20  ;;  %vm852_vm9 = vweird.f32 %v1202_v21 }
 0x7d8   : > { %vm853_vm11 = vmor %vm851_vm10, %vm852_vm9 }
 0x7d9   : > { %v847_v23 = vmul.f32 %v1202_v21, %v846_v22 }
 0x7db   : > { %v848_v24 = vmul.f32 0.5, %v847_v23 }
 0x7dd   : > { %v849_v25 = vsub.f32 1.5, %v848_v24 }
 0x7df   : > { %v850_v26 = vmul.f32 %v1202_v21, %v849_v25 }
 0x7e1   : > { %v854_v28 = vsel %vm853_vm11, %v1202_v21, %v850_v26 }
 0x7e2   : > { %v855_v29 = vmul.f32 %v854_v28, %v838_v14 }
 0x7e4   : > { %v859_v30 = vmul.f32 %v1177_v27, %v855_v29 }
 0x7e6   : > { %v863_v31 = vadd.f32 %v1178_v8, %v859_v30 }
 0x7e8   : > { %v864_v32 = vpack.c.bf16 %v863_v31, %v863_v31 }
 0x7ea   : > { %1100 = vmatmul.msk.bf16.vlgmr.msra.gmra.mxu1 %vm468_vm0, %v864_v32 }
 0x867   : > { %v897_v42 = vpop.f32.mrf.mxu1 }
 0x868   : > { %v898_v43 = vadd.f32 %v1179_v41, %v897_v42 }
 0x86a   : > { %v1101_v44 = vmul.f32 -1.702, %v898_v43 }
 0x86c   : > { %v903_v45 = vmul.f32 1.442695, %v1101_v44 }
 0x86e   : > { %1203 = vpow2.f32 %v903_v45 }
 0x86f   : > { %v899_v46 = vpop.f32.mrf.mxu1 }
 0x874   : > { %v1204_v47 = vpop.eup %1203 }
 0x875   : > { %v905_v48 = vadd.f32 1.0, %v1204_v47 }
 0x877   : > { %1205 = vrcp.f32 %v905_v48  ;;  %v917_v52 = vand.u32 2147483648, %v905_v48  ;;  %v915_v54 = vand.u32 2147483647, %v905_v48  ;;  %vm911_vm13 = vweird.f32 %v905_v48 }
 0x879   : > { %v918_v56 = vor.u32 1.1754944e-38, %v917_v52  ;;  %vm916_vm15 = vcmp.eq.f32.partialorder %v915_v54, 8.507059e+37 }
 0x87d   : > { %v1206_v49 = vpop.eup %1205 }
 0x87e   : > { %v907_v50 = vmul.f32 %v1206_v49, %v905_v48  ;;  %vm912_vm12 = vweird.f32 %v1206_v49 }
 0x87f   : > { %vm913_vm14 = vmor %vm911_vm13, %vm912_vm12 }
 0x880   : > { %v908_v51 = vsub.f32 1.0, %v907_v50 }
 0x882   : > { %v909_v53 = vmul.f32 %v1206_v49, %v908_v51 }
 0x884   : > { %v910_v55 = vadd.f32 %v1206_v49, %v909_v53 }
 0x886   : > { %v914_v57 = vsel %vm913_vm14, %v1206_v49, %v910_v55 }
 0x887   : > { %v919_v58 = vsel %vm916_vm15, %v918_v56, %v914_v57 }
 0x888   : > { %v921_v59 = vmul.f32 %v919_v58, %v898_v43 }
 0x88a   : > { %v922_v60 = vpack.c.bf16 %v921_v59, %v921_v59 }
 0x88c   : > { %999 = vmatmul.bf16.vlgmr.msrb.gmra.mxu3 %v922_v60 }
 0x90f   : > { %v1000_v62 = vpop.f32.mrf.mxu3 }
 0x910   : > { %v1001_v63 = vadd.f32 %v1180_v61, %v1000_v62 }
 0x912   : > { %v1004_v1 = vadd.f32 %v1001_v63, %v1403_v10 }
 0x914   : > { %1005 = vst.msk [vmem:[%s462_s16] sm:$0xff] %vm468_vm0, %v1004_v1 }
 0x917   : > { %v1002_v3 = vpop.f32.mrf.mxu3 }
 0x918 PF: > { %s24_s29 = sadd.s32 1, %s1213_s29  }
 0x919   : > { %p21_p4 = scmp.ge.s32.totalorder %s24_s29, 4  }
 0x91b   :  { %23 = sbr.rel (!%p21_p4) target bundleno = 1 (0x1), region = 106 }

</bundles_post_ra>
